<compile_context>
chip_gen: v7x
topology: tpu7x:2x2x1
jax: 0.10.0
libtpu: 0.0.40
codegen_flags: <defaults>
</compile_context>

<pallas_src>
import functools

import jax
import jax.numpy as jnp
from jax.experimental import pallas as pl
from jax.experimental.pallas import tpu as pltpu


# ----------------------------------------------------------------------------
# Kernel bodies
# ----------------------------------------------------------------------------
def _doc_cnn_tile(xt_ref, wc_ref, bc_ref, wt_ref, bt_ref, *, l_out):
    """Text encoder on one batch tile.

    xt_ref: (TB, Lp, A)  bf16  NWC character sequence (Lp padded to a sublane multiple)
    wc_ref: (K, A, C)    bf16  Conv1d weight, per-tap (A, C) matrices
    bc_ref: (1, C)       f32
    wt_ref: (C, E)       bf16  (already scaled by 1/l_out on the host)
    bt_ref: (1, E)       f32
    returns (TB, E) f32
    """
    TB, Lp, A = xt_ref.shape
    K = wc_ref.shape[0]
    R = TB * Lp

    # Collapse batch and time: one big (R, A) x (A, C) matmul per conv tap.
    # Lp % 16 == 0 keeps the reshape a pure (bf16-packed) layout reinterpretation.
    x2 = xt_ref[...].reshape(R, A)

    # Valid Conv1d as K shifted full-length matmuls, accumulated in f32.
    # After rolling hk by -k, row r (= b*Lp + t) holds x[b, t+k, :] @ W_k for all t < l_out
    # (t + k <= L-1 < Lp, so valid rows never cross a batch boundary); rows t >= l_out pick
    # up wrap garbage but are dropped before pooling.
    acc = jnp.dot(x2, wc_ref[0], preferred_element_type=jnp.float32)       # (R, C)
    for k in range(1, K):                                                   # K small -> unrolled
        hk = jnp.dot(x2, wc_ref[k], preferred_element_type=jnp.float32)
        acc = acc + jnp.roll(hk, -k, axis=0)

    # bias + ReLU per position (f32), then temporal SUM over the l_out valid positions
    # (the 1/l_out mean scale is folded into wt_ref by the wrapper).
    C = acc.shape[1]
    h = jnp.maximum(acc + bc_ref[...], 0.0)                                 # (R, C)
    pooled = jnp.sum(h.reshape(TB, Lp, C)[:, :l_out, :], axis=1)            # (TB, C) f32

    # Final projection to the joint embedding space (bf16 MXU, f32 accumulate).
    return (jnp.dot(pooled.astype(jnp.bfloat16), wt_ref[...],
                    preferred_element_type=jnp.float32) + bt_ref[...])


def _fused_kernel(xt_ref, xi_ref, wc_ref, bc_ref, wt_ref, bt_ref, wi_ref, bi_ref,
                  txt_o_ref, img_o_ref, *, l_out):
    """Fused text + image branches over one batch tile; one full-block store each."""
    txt_o_ref[...] = _doc_cnn_tile(xt_ref, wc_ref, bc_ref, wt_ref, bt_ref, l_out=l_out)
    img_o_ref[...] = (jnp.dot(xi_ref[...], wi_ref[...],
                              preferred_element_type=jnp.float32) + bi_ref[...])


def _text_kernel(xt_ref, wc_ref, bc_ref, wt_ref, bt_ref, txt_o_ref, *, l_out):
    """Text branch only (used when image_noop=True: the image encoder is identity)."""
    txt_o_ref[...] = _doc_cnn_tile(xt_ref, wc_ref, bc_ref, wt_ref, bt_ref, l_out=l_out)


# ----------------------------------------------------------------------------
# Wrapper
# ----------------------------------------------------------------------------
@functools.partial(jax.jit, static_argnames=("image_noop",))
def multimodal_embedding(fea_txt, fea_img, params, image_noop=False):
    """Pallas implementation of MultiModalEmbedding.forward.

    fea_txt: (B, alphasize, seq_len)  NCW, as a PyTorch nn.Conv1d input
    fea_img: (B, img_dim)
    """
    W_conv, b_conv = params["W_conv"], params["b_conv"]
    W_txt, b_txt = params["W_txt"], params["b_txt"]
    W_img, b_img = params["W_img"], params["b_img"]

    C, A, K = W_conv.shape            # PyTorch Conv1d weight layout (out, in, k)
    E = W_txt.shape[1]
    B, _, L = fea_txt.shape
    L_out = L - K + 1
    img_dim = fea_img.shape[1]

    # ---- layout prep in XLA (cheap, no data expansion) ----------------------
    # NCW -> NWC so the alphabet dim sits on lanes; bf16 operands for the MXU.
    xt = jnp.transpose(fea_txt, (0, 2, 1)).astype(jnp.bfloat16)       # (B, L, A)
    Lp = -(-L // 16) * 16                                             # bf16 sublane-pack multiple
    if Lp != L:
        xt = jnp.pad(xt, ((0, 0), (0, Lp - L), (0, 0)))               # zero rows never pooled

    wc = jnp.transpose(W_conv, (2, 1, 0)).astype(jnp.bfloat16)        # (K, A, C)
    bc = b_conv.reshape(1, C).astype(jnp.float32)
    # Fold the temporal-mean 1/L_out into the projection weight (free, done once in XLA).
    wt = (W_txt * (1.0 / L_out)).astype(jnp.bfloat16)                 # (C, E)
    bt = b_txt.reshape(1, E).astype(jnp.float32)

    # ---- batch tiling --------------------------------------------------------
    # Budget the per-tile f32 conv intermediate (Lp*C*4 B/row) plus the double-buffered bf16
    # text tile (2*Lp*A*2 B/row) at ~4 MiB so everything fits comfortably under v7x's
    # 32 MiB scoped VMEM even at real SJE sizes.
    bytes_per_row = Lp * (4 * C + 4 * A)
    tb = (4 * 1024 * 1024) // max(1, bytes_per_row)
    tb = max(8, (tb // 8) * 8)
    TB = min(B, tb, 512)
    Bp = -(-B // TB) * TB
    if Bp != B:
        xt = jnp.pad(xt, ((0, Bp - B), (0, 0), (0, 0)))
    grid = (Bp // TB,)                # >=2 steps shard across v7x's two TensorCores for real B

    cparams = pltpu.CompilerParams(
        dimension_semantics=("parallel",),
        vmem_limit_bytes=32 * 1024 * 1024,
    )

    xt_spec = pl.BlockSpec((TB, Lp, A), lambda b: (b, 0, 0))
    wc_spec = pl.BlockSpec((K, A, C), lambda b: (0, 0, 0))
    bc_spec = pl.BlockSpec((1, C), lambda b: (0, 0))
    wt_spec = pl.BlockSpec((C, E), lambda b: (0, 0))
    bt_spec = pl.BlockSpec((1, E), lambda b: (0, 0))
    out_spec = pl.BlockSpec((TB, E), lambda b: (b, 0))

    if image_noop:
        txt = pl.pallas_call(
            functools.partial(_text_kernel, l_out=L_out),
            out_shape=jax.ShapeDtypeStruct((Bp, E), jnp.float32),
            grid=grid,
            in_specs=[xt_spec, wc_spec, bc_spec, wt_spec, bt_spec],
            out_specs=out_spec,
            compiler_params=cparams,
        )(xt, wc, bc, wt, bt)
        img = fea_img.astype(jnp.float32)                             # identity image encoder
    else:
        xi = fea_img.astype(jnp.bfloat16)
        if Bp != B:
            xi = jnp.pad(xi, ((0, Bp - B), (0, 0)))
        wi = W_img.astype(jnp.bfloat16)
        bi = b_img.reshape(1, E).astype(jnp.float32)

        txt, img = pl.pallas_call(
            functools.partial(_fused_kernel, l_out=L_out),
            out_shape=(jax.ShapeDtypeStruct((Bp, E), jnp.float32),
                       jax.ShapeDtypeStruct((Bp, E), jnp.float32)),
            grid=grid,
            in_specs=[xt_spec,
                      pl.BlockSpec((TB, img_dim), lambda b: (b, 0)),
                      wc_spec, bc_spec, wt_spec, bt_spec,
                      pl.BlockSpec((img_dim, E), lambda b: (0, 0)),
                      pl.BlockSpec((1, E), lambda b: (0, 0))],
            out_specs=(out_spec, out_spec),
            compiler_params=cparams,
        )(xt, xi, wc, bc, wt, bt, wi, bi)
        if Bp != B:
            img = img[:B]

    if Bp != B:
        txt = txt[:B]
    return txt, img


# ----------------------------------------------------------------------------
# Plain-JAX reference (correctness check only)
# ----------------------------------------------------------------------------
def reference(fea_txt, fea_img, params, image_noop=False):
    W_conv, b_conv = params["W_conv"], params["b_conv"]
    W_txt, b_txt = params["W_txt"], params["b_txt"]
    W_img, b_img = params["W_img"], params["b_img"]
    h = jax.lax.conv_general_dilated(
        fea_txt.astype(jnp.float32), W_conv, window_strides=(1,),
        padding="VALID", dimension_numbers=("NCH", "OIH", "NCH"))
    h = jnp.maximum(h + b_conv[None, :, None], 0.0)
    pooled = jnp.mean(h, axis=2)
    txt = pooled @ W_txt + b_txt
    img = fea_img.astype(jnp.float32) if image_noop else fea_img @ W_img + b_img
    return txt, img


# ----------------------------------------------------------------------------
# Main
# ----------------------------------------------------------------------------
if __name__ == "__main__":
    B, alphasize, seq_len = 2, 16, 16
    K, cnn_dim, emb_dim, img_dim = 4, 32, 32, 24

    keys = jax.random.split(jax.random.PRNGKey(0), 8)
    params = {
        "W_conv": 0.05 * jax.random.normal(keys[0], (cnn_dim, alphasize, K), jnp.float32),
        "b_conv": 0.01 * jax.random.normal(keys[1], (cnn_dim,), jnp.float32),
        "W_txt":  0.05 * jax.random.normal(keys[2], (cnn_dim, emb_dim), jnp.float32),
        "b_txt":  0.01 * jax.random.normal(keys[3], (emb_dim,), jnp.float32),
        "W_img":  0.05 * jax.random.normal(keys[4], (img_dim, emb_dim), jnp.float32),
        "b_img":  0.01 * jax.random.normal(keys[5], (emb_dim,), jnp.float32),
    }
    fea_txt = jax.random.normal(keys[6], (B, alphasize, seq_len), jnp.float32)   # NCW
    fea_img = jax.random.normal(keys[7], (B, img_dim), jnp.float32)

    # fused path
    txt_out, img_out = multimodal_embedding(fea_txt, fea_img, params, image_noop=False)
    jax.block_until_ready((txt_out, img_out))

    txt_ref, img_ref = reference(fea_txt, fea_img, params, image_noop=False)
    assert txt_out.shape == (B, emb_dim) and img_out.shape == (B, emb_dim)
    # bf16 MXU operands with f32 accumulation -> ~1e-3 level deviation from the f32 reference
    assert jnp.allclose(txt_out, txt_ref, atol=1e-2, rtol=1e-2)
    assert jnp.allclose(img_out, img_ref, atol=1e-2, rtol=1e-2)

    # image_noop path (identity image encoder)
    txt2, img2 = multimodal_embedding(fea_txt, fea_img, params, image_noop=True)
    jax.block_until_ready((txt2, img2))
    assert jnp.allclose(txt2, txt_ref, atol=1e-2, rtol=1e-2)
    assert jnp.allclose(img2, fea_img.astype(jnp.float32), atol=1e-6)

    print("KERNEL_OK")
</pallas_src>

<mosaic_0001>
module attributes {stable_mosaic.version = 11 : i64} {
  func.func @_fused_kernel(%arg0: i32, %arg1: memref<2x16x16xbf16, #tpu.memory_space<vmem>>, %arg2: memref<2x24xbf16, #tpu.memory_space<vmem>>, %arg3: memref<4x16x32xbf16, #tpu.memory_space<vmem>>, %arg4: memref<1x32xf32, #tpu.memory_space<vmem>>, %arg5: memref<32x32xbf16, #tpu.memory_space<vmem>>, %arg6: memref<1x32xf32, #tpu.memory_space<vmem>>, %arg7: memref<24x32xbf16, #tpu.memory_space<vmem>>, %arg8: memref<1x32xf32, #tpu.memory_space<vmem>>, %arg9: memref<2x32xf32, #tpu.memory_space<vmem>>, %arg10: memref<2x32xf32, #tpu.memory_space<vmem>>) attributes {dimension_semantics = [#tpu.dimension_semantics<parallel>], iteration_bounds = array<i64: 1>, scalar_prefetch = 0 : i64, scratch_operands = 0 : i64, tpu.core_type = #tpu.core_type<tc>, window_params = [{transform_indices = @transform_0, window_bounds = array<i64: 2, 16, 16>}, {transform_indices = @transform_1, window_bounds = array<i64: 2, 24>}, {pipeline_mode = #tpu.pipeline_mode<synchronous>, transform_indices = @transform_2, window_bounds = array<i64: 4, 16, 32>}, {pipeline_mode = #tpu.pipeline_mode<synchronous>, transform_indices = @transform_3, window_bounds = array<i64: 1, 32>}, {pipeline_mode = #tpu.pipeline_mode<synchronous>, transform_indices = @transform_4, window_bounds = array<i64: 32, 32>}, {pipeline_mode = #tpu.pipeline_mode<synchronous>, transform_indices = @transform_5, window_bounds = array<i64: 1, 32>}, {pipeline_mode = #tpu.pipeline_mode<synchronous>, transform_indices = @transform_6, window_bounds = array<i64: 24, 32>}, {pipeline_mode = #tpu.pipeline_mode<synchronous>, transform_indices = @transform_7, window_bounds = array<i64: 1, 32>}, {transform_indices = @transform_8, window_bounds = array<i64: 2, 32>}, {transform_indices = @transform_9, window_bounds = array<i64: 2, 32>}]} {
    %c0 = arith.constant 0 : index
    %c0_0 = arith.constant 0 : index
    %c0_1 = arith.constant 0 : index
    %0 = vector.load %arg1[%c0, %c0_0, %c0_1] : memref<2x16x16xbf16, #tpu.memory_space<vmem>>, vector<2x16x16xbf16>
    %1 = vector.shape_cast %0 : vector<2x16x16xbf16> to vector<32x16xbf16>
    %c0_2 = arith.constant 0 : index
    %c0_3 = arith.constant 0 : index
    %c0_4 = arith.constant 0 : index
    %2 = vector.load %arg3[%c0_2, %c0_3, %c0_4] : memref<4x16x32xbf16, #tpu.memory_space<vmem>>, vector<1x16x32xbf16>
    %3 = vector.shape_cast %2 : vector<1x16x32xbf16> to vector<16x32xbf16>
    %cst = arith.constant dense<0.000000e+00> : vector<32x32xf32>
    %4 = tpu.matmul %1, %3, %cst {dimension_numbers = #tpu.dot_dimension_numbers<[1], [0], [0], [1], [0, 0, 1, 1], [], []>} : vector<32x16xbf16>, vector<16x32xbf16>, vector<32x32xf32> -> vector<32x32xf32>
    %c1 = arith.constant 1 : index
    %c0_5 = arith.constant 0 : index
    %c0_6 = arith.constant 0 : index
    %5 = vector.load %arg3[%c1, %c0_5, %c0_6] : memref<4x16x32xbf16, #tpu.memory_space<vmem>>, vector<1x16x32xbf16>
    %6 = vector.shape_cast %5 : vector<1x16x32xbf16> to vector<16x32xbf16>
    %cst_7 = arith.constant dense<0.000000e+00> : vector<32x32xf32>
    %7 = tpu.matmul %1, %6, %cst_7 {dimension_numbers = #tpu.dot_dimension_numbers<[1], [0], [0], [1], [0, 0, 1, 1], [], []>} : vector<32x16xbf16>, vector<16x32xbf16>, vector<32x32xf32> -> vector<32x32xf32>
    %8 = vector.extract_strided_slice %7 {offsets = [1, 0], sizes = [31, 32], strides = [1, 1]} : vector<32x32xf32> to vector<31x32xf32>
    %9 = vector.extract_strided_slice %7 {offsets = [0, 0], sizes = [1, 32], strides = [1, 1]} : vector<32x32xf32> to vector<1x32xf32>
    %10 = tpu.concatenate %8, %9 in 0 : vector<31x32xf32>, vector<1x32xf32> -> vector<32x32xf32>
    %11 = arith.addf %4, %10 : vector<32x32xf32>
    %c2 = arith.constant 2 : index
    %c0_8 = arith.constant 0 : index
    %c0_9 = arith.constant 0 : index
    %12 = vector.load %arg3[%c2, %c0_8, %c0_9] : memref<4x16x32xbf16, #tpu.memory_space<vmem>>, vector<1x16x32xbf16>
    %13 = vector.shape_cast %12 : vector<1x16x32xbf16> to vector<16x32xbf16>
    %cst_10 = arith.constant dense<0.000000e+00> : vector<32x32xf32>
    %14 = tpu.matmul %1, %13, %cst_10 {dimension_numbers = #tpu.dot_dimension_numbers<[1], [0], [0], [1], [0, 0, 1, 1], [], []>} : vector<32x16xbf16>, vector<16x32xbf16>, vector<32x32xf32> -> vector<32x32xf32>
    %15 = vector.extract_strided_slice %14 {offsets = [2, 0], sizes = [30, 32], strides = [1, 1]} : vector<32x32xf32> to vector<30x32xf32>
    %16 = vector.extract_strided_slice %14 {offsets = [0, 0], sizes = [2, 32], strides = [1, 1]} : vector<32x32xf32> to vector<2x32xf32>
    %17 = tpu.concatenate %15, %16 in 0 : vector<30x32xf32>, vector<2x32xf32> -> vector<32x32xf32>
    %18 = arith.addf %11, %17 : vector<32x32xf32>
    %c3 = arith.constant 3 : index
    %c0_11 = arith.constant 0 : index
    %c0_12 = arith.constant 0 : index
    %19 = vector.load %arg3[%c3, %c0_11, %c0_12] : memref<4x16x32xbf16, #tpu.memory_space<vmem>>, vector<1x16x32xbf16>
    %20 = vector.shape_cast %19 : vector<1x16x32xbf16> to vector<16x32xbf16>
    %cst_13 = arith.constant dense<0.000000e+00> : vector<32x32xf32>
    %21 = tpu.matmul %1, %20, %cst_13 {dimension_numbers = #tpu.dot_dimension_numbers<[1], [0], [0], [1], [0, 0, 1, 1], [], []>} : vector<32x16xbf16>, vector<16x32xbf16>, vector<32x32xf32> -> vector<32x32xf32>
    %22 = vector.extract_strided_slice %21 {offsets = [3, 0], sizes = [29, 32], strides = [1, 1]} : vector<32x32xf32> to vector<29x32xf32>
    %23 = vector.extract_strided_slice %21 {offsets = [0, 0], sizes = [3, 32], strides = [1, 1]} : vector<32x32xf32> to vector<3x32xf32>
    %24 = tpu.concatenate %22, %23 in 0 : vector<29x32xf32>, vector<3x32xf32> -> vector<32x32xf32>
    %25 = arith.addf %18, %24 : vector<32x32xf32>
    %c0_14 = arith.constant 0 : index
    %c0_15 = arith.constant 0 : index
    %26 = vector.load %arg4[%c0_14, %c0_15] : memref<1x32xf32, #tpu.memory_space<vmem>>, vector<1x32xf32>
    %27 = vector.broadcast %26 : vector<1x32xf32> to vector<32x32xf32>
    %28 = arith.addf %25, %27 : vector<32x32xf32>
    %cst_16 = arith.constant 0.000000e+00 : f32
    %29 = vector.broadcast %cst_16 : f32 to vector<32x32xf32>
    %30 = arith.maximumf %28, %29 : vector<32x32xf32>
    %31 = vector.shape_cast %30 : vector<32x32xf32> to vector<2x16x32xf32>
    %32 = vector.extract_strided_slice %31 {offsets = [0, 0, 0], sizes = [2, 13, 32], strides = [1, 1, 1]} : vector<2x16x32xf32> to vector<2x13x32xf32>
    %cst_17 = arith.constant dense<0.000000e+00> : vector<2x32xf32>
    %33 = vector.multi_reduction <add>, %32, %cst_17 [1] : vector<2x13x32xf32> to vector<2x32xf32>
    %34 = arith.truncf %33 : vector<2x32xf32> to vector<2x32xbf16>
    %c0_18 = arith.constant 0 : index
    %c0_19 = arith.constant 0 : index
    %35 = vector.load %arg5[%c0_18, %c0_19] : memref<32x32xbf16, #tpu.memory_space<vmem>>, vector<32x32xbf16>
    %cst_20 = arith.constant dense<0.000000e+00> : vector<2x32xf32>
    %36 = tpu.matmul %34, %35, %cst_20 {dimension_numbers = #tpu.dot_dimension_numbers<[1], [0], [0], [1], [0, 0, 1, 1], [], []>} : vector<2x32xbf16>, vector<32x32xbf16>, vector<2x32xf32> -> vector<2x32xf32>
    %c0_21 = arith.constant 0 : index
    %c0_22 = arith.constant 0 : index
    %37 = vector.load %arg6[%c0_21, %c0_22] : memref<1x32xf32, #tpu.memory_space<vmem>>, vector<1x32xf32>
    %38 = vector.broadcast %37 : vector<1x32xf32> to vector<2x32xf32>
    %39 = arith.addf %36, %38 : vector<2x32xf32>
    %c0_23 = arith.constant 0 : index
    %c0_24 = arith.constant 0 : index
    %40 = vector.load %arg9[%c0_23, %c0_24] : memref<2x32xf32, #tpu.memory_space<vmem>>, vector<2x32xf32>
    tpu.vector_store %arg9[%c0_23, %c0_24], %39 {strides = array<i32>} : memref<2x32xf32, #tpu.memory_space<vmem>>, vector<2x32xf32>,
    %c0_25 = arith.constant 0 : index
    %c0_26 = arith.constant 0 : index
    %41 = vector.load %arg2[%c0_25, %c0_26] : memref<2x24xbf16, #tpu.memory_space<vmem>>, vector<2x24xbf16>
    %c0_27 = arith.constant 0 : index
    %c0_28 = arith.constant 0 : index
    %42 = vector.load %arg7[%c0_27, %c0_28] : memref<24x32xbf16, #tpu.memory_space<vmem>>, vector<24x32xbf16>
    %cst_29 = arith.constant dense<0.000000e+00> : vector<2x32xf32>
    %43 = tpu.matmul %41, %42, %cst_29 {dimension_numbers = #tpu.dot_dimension_numbers<[1], [0], [0], [1], [0, 0, 1, 1], [], []>} : vector<2x24xbf16>, vector<24x32xbf16>, vector<2x32xf32> -> vector<2x32xf32>
    %c0_30 = arith.constant 0 : index
    %c0_31 = arith.constant 0 : index
    %44 = vector.load %arg8[%c0_30, %c0_31] : memref<1x32xf32, #tpu.memory_space<vmem>>, vector<1x32xf32>
    %45 = vector.broadcast %44 : vector<1x32xf32> to vector<2x32xf32>
    %46 = arith.addf %43, %45 : vector<2x32xf32>
    %c0_32 = arith.constant 0 : index
    %c0_33 = arith.constant 0 : index
    %47 = vector.load %arg10[%c0_32, %c0_33] : memref<2x32xf32, #tpu.memory_space<vmem>>, vector<2x32xf32>
    tpu.vector_store %arg10[%c0_32, %c0_33], %46 {strides = array<i32>} : memref<2x32xf32, #tpu.memory_space<vmem>>, vector<2x32xf32>,
    return
  }
  func.func @transform_0(%arg0: i32) -> (i32, i32, i32) {
    %c0_i32 = arith.constant 0 : i32
    %c0_i32_0 = arith.constant 0 : i32
    %c0_i32_1 = arith.constant 0 : i32
    return %arg0, %c0_i32, %c0_i32_0 : i32, i32, i32
  }
  func.func @transform_1(%arg0: i32) -> (i32, i32) {
    %c0_i32 = arith.constant 0 : i32
    %c0_i32_0 = arith.constant 0 : i32
    return %arg0, %c0_i32 : i32, i32
  }
  func.func @transform_2(%arg0: i32) -> (i32, i32, i32) {
    %c0_i32 = arith.constant 0 : i32
    %c0_i32_0 = arith.constant 0 : i32
    %c0_i32_1 = arith.constant 0 : i32
    %c0_i32_2 = arith.constant 0 : i32
    return %c0_i32, %c0_i32_0, %c0_i32_1 : i32, i32, i32
  }
  func.func @transform_3(%arg0: i32) -> (i32, i32) {
    %c0_i32 = arith.constant 0 : i32
    %c0_i32_0 = arith.constant 0 : i32
    %c0_i32_1 = arith.constant 0 : i32
    return %c0_i32, %c0_i32_0 : i32, i32
  }
  func.func @transform_4(%arg0: i32) -> (i32, i32) {
    %c0_i32 = arith.constant 0 : i32
    %c0_i32_0 = arith.constant 0 : i32
    %c0_i32_1 = arith.constant 0 : i32
    return %c0_i32, %c0_i32_0 : i32, i32
  }
  func.func @transform_5(%arg0: i32) -> (i32, i32) {
    %c0_i32 = arith.constant 0 : i32
    %c0_i32_0 = arith.constant 0 : i32
    %c0_i32_1 = arith.constant 0 : i32
    return %c0_i32, %c0_i32_0 : i32, i32
  }
  func.func @transform_6(%arg0: i32) -> (i32, i32) {
    %c0_i32 = arith.constant 0 : i32
    %c0_i32_0 = arith.constant 0 : i32
    %c0_i32_1 = arith.constant 0 : i32
    return %c0_i32, %c0_i32_0 : i32, i32
  }
  func.func @transform_7(%arg0: i32) -> (i32, i32) {
    %c0_i32 = arith.constant 0 : i32
    %c0_i32_0 = arith.constant 0 : i32
    %c0_i32_1 = arith.constant 0 : i32
    return %c0_i32, %c0_i32_0 : i32, i32
  }
  func.func @transform_8(%arg0: i32) -> (i32, i32) {
    %c0_i32 = arith.constant 0 : i32
    %c0_i32_0 = arith.constant 0 : i32
    return %arg0, %c0_i32 : i32, i32
  }
  func.func @transform_9(%arg0: i32) -> (i32, i32) {
    %c0_i32 = arith.constant 0 : i32
    %c0_i32_0 = arith.constant 0 : i32
    return %arg0, %c0_i32 : i32, i32
  }
}

</mosaic_0001>

<bundles_post_ra>
// kernel: multimodal_embedding.1
= control target key start
LH: loop header
LB: loop body
LE: loop exit
PB: predicated region body
PF: predicated region fallthrough
CT: control target
= control target key end

     0   :  { %15 = vsyncpa [#allocation3], 0  ;;  %vm59_vm0 = vcmask 130048   ;;  %s847_s0 = inlined_call_operand.vmem [shape: bf16[2,16,16], index: 0, kind: input, shape index: {}]   ;;  %s848_s1 = inlined_call_operand.vmem [shape: bf16[2,24], index: 1, kind: input, shape index: {}]   ;;  %s849_s2 = inlined_call_operand.vmem [shape: bf16[4,16,32], index: 2, kind: input, shape index: {}]   ;;  %s850_s3 = inlined_call_operand.vmem [shape: f32[1,32], index: 3, kind: input, shape index: {}]   ;;  %s851_s4 = inlined_call_operand.vmem [shape: bf16[32,32], index: 4, kind: input, shape index: {}]   ;;  %s852_s5 = inlined_call_operand.vmem [shape: f32[1,32], index: 5, kind: input, shape index: {}]   ;;  %s853_s6 = inlined_call_operand.vmem [shape: bf16[24,32], index: 6, kind: input, shape index: {}]   ;;  %s854_s7 = inlined_call_operand.vmem [shape: f32[1,32], index: 7, kind: input, shape index: {}]   ;;  %s855_s8 = inlined_call_operand.hbm [shape: f32[2,32], index: 8, kind: output, shape index: {0}]   ;;  %s856_s9 = inlined_call_operand.hbm [shape: f32[2,32], index: 9, kind: output, shape index: {1}]  }
   0x1   :  { %v648_v0 = vld [vmem:[%s849_s2 + $0x8] sm:$0xff]   ;;  %v649_v1 = vld [vmem:[%s849_s2] sm:$0xff]   ;;  %v652_v4 = vld [vmem:[%s849_s2 + $0x10] sm:$0xff]  }
   0x2   :  { %604 = vmatprep.subr.bf16.mxu0 %v648_v0  ;;  %v650_v2 = vld [vmem:[%s847_s0] sm:$0xff]   ;;  %610 = vmatprep.subr.bf16.mxu1 %v649_v1  ;;  %v651_v3 = vld [vmem:[%s847_s0 + $0x8] sm:$0xff]   ;;  %v653_v5 = vld [vmem:[%s849_s2 + $0x18] sm:$0xff]  }
   0x3   :  { %605 = vmatpush3.bf16.msra.mxu0 %v648_v0  ;;  %611 = vmatpush3.bf16.msra.mxu1 %v649_v1 }
   0x4   :  { %606 = vmatprep.mubr.msk.bf16.mxu0 %vm59_vm0, %v650_v2  ;;  %612 = vmatprep.mubr.msk.bf16.mxu1 %vm59_vm0, %v650_v2 }
   0x5   :  { %616 = vmatprep.subr.bf16.mxu0 %v652_v4  ;;  %622 = vmatprep.subr.bf16.mxu1 %v653_v5 }
   0x6   :  { %607 = vmatmul.mubr.msk.bf16.vlgmr.msra.gmra.mrb[0].mxu0 %vm59_vm0, %v651_v3  ;;  %613 = vmatmul.mubr.msk.bf16.vlgmr.msra.gmra.mrb[0].mxu1 %vm59_vm0, %v651_v3 }
   0x7   :  { %617 = vmatpush3.bf16.msra.mxu0 %v652_v4  ;;  %618 = vmatprep.mubr.msk.bf16.mxu0 %vm59_vm0, %v650_v2 }
   0x8   :  { %16 = vsyncpa [#allocation5], 0  ;;  %623 = vmatpush3.bf16.msra.mxu1 %v653_v5  ;;  %624 = vmatprep.mubr.msk.bf16.mxu1 %vm59_vm0, %v650_v2  ;;  %v654_v6 = vld [vmem:[%s853_s6] sm:$0xff]   ;;  %v656_v8 = vld [vmem:[%s853_s6 + $0x8] ss:$0 sps:$4 sm:$0xff]   ;;  %vm484_vm1 = vcmask 1043456  }
   0x9   :  { %v655_v7 = vld [vmem:[%s851_s4] sm:$0xff]   ;;  %v706_v9 = vmov 0.0   ;;  %v657_v10 = vld [vmem:[%s851_s4 + $0x8] sm:$0xff]   ;;  %v486_v11 = vsel %vm484_vm1, %v656_v8, 0  ;;  %vm707_vm2 = vmmov 0   ;;  %vm480_vm3 = vcmask 195584  }
   0xa   :  { %636 = vmatprep.subr.bf16.mxu1 %v706_v9  ;;  %628 = vmatprep.subr.bf16.mxu0 %v706_v9  ;;  %v460_v12 = vld [vmem:[%s848_s1] sm:$0x1]  ;;  %vm119_vm4 = vcmask 1046528   ;;  %vm250_vm5 = vcmask 1045504   ;;  %vm330_vm6 = vcmask 1044480   ;;  %vm363_vm7 = vcmask 261120  }
   0xb   :  { %v577_v55 = vld [vmem:[%s850_s3] ss:$0 sm:$0xff]  ;;  %vm365_vm8 = vcmask 258048   ;;  %vm400_vm9 = vcmask 1041409   ;;  %vm458_vm10 = vcmask 254976   ;;  %s708_s29 = smov [#allocation4]  }
   0xc   :  { %s545_s30 = sshll.u32 %s708_s29, 4  ;;  %s546_s30 = int_to_ptr.vmem [resolvable:$true] %s545_s30 }
   0xd   :  { %s658_s10 = scalar_lea.vmem %s546_s30, 32  ;;  %p663_p1 = scmp.lt.s32.totalorder %s546_s30, %s546_s30 }
   0xe   :  { %619 = vmatmul.mubr.msk.bf16.vlgmr.msra.gmra.mrb[4].mxu0 %vm59_vm0, %v651_v3  ;;  %625 = vmatmul.mubr.msk.bf16.vlgmr.msra.gmra.mrb[4].mxu1 %vm59_vm0, %v651_v3  ;;  %p659_p0 = scmp.ne.s32.totalorder %s546_s30, %s658_s10  ;;  %p664_p2 = scmp.lt.s32.totalorder %s658_s10, %s658_s10 }
   0xf   :  { %637 = vmatpush3.bf16.msra.mxu1 %v654_v6  ;;  %629 = vmatpush3.bf16.msra.mxu0 %v655_v7 }
  0x10   :  { %638 = vmatprep.subr.bf16.mxu1 %v706_v9  ;;  %630 = vmatprep.subr.bf16.mxu0 %v706_v9  ;;  %p665_p3 = por %p664_p2, %p663_p1 }
  0x11   :  { %640 = vmatprep.mubr.msk.bf16.mxu1 %vm707_vm2, %v706_v9  ;;  %632 = vmatprep.mubr.msk.bf16.mxu0 %vm707_vm2, %v706_v9 }
  0x12   :  { %p666_p4 = pnand %p665_p3, %p659_p0 }
  0x13   :  { %639 = vmatpush3.bf16.msra.mxu1 %v486_v11  ;;  %631 = vmatpush3.bf16.msra.mxu0 %v657_v10 }
  0x16   :  { %641 = vmatmul.mubr.msk.bf16.vlgmr.msra.gmra.mrb[8].mxu1 %vm480_vm3, %v460_v12 }
  0xd9   :  { %v608_v13 = vpop.f32.mrb[0].mxu0  ;;  %v614_v14 = vpop.f32.mrb[0].mxu1 }
  0xda   :  { %v100_v15 = vpop.f32.mrb[1].mxu0  ;;  %v173_v17 = vpop.f32.mrb[1].mxu1  ;;  %v123_v19 = vrot.slane %v608_v13, 1 }
  0xdb   :  { %v120_v16 = vrot.slane %v100_v15, 1  ;;  %v609_v18 = vpop.f32.mrb[2].mxu0  ;;  %v615_v21 = vpop.f32.mrb[2].mxu1 }
  0xdc   :  { %v125_v20 = vrot.slane %v609_v18, 1  ;;  %v103_v22 = vpop.f32.mrb[3].mxu0  ;;  %v176_v24 = vpop.f32.mrb[3].mxu1 }
  0xdd   :  { %v121_v23 = vrot.slane %v103_v22, 1 }
  0xde   :  { %v126_v25 = vsel %vm119_vm4, %v123_v19, %v125_v20  ;;  %v132_v26 = vsel %vm119_vm4, %v125_v20, %v120_v16 }
  0xdf   :  { %v182_v27 = vadd.f32 %v614_v14, %v126_v25  ;;  %v185_v28 = vadd.f32 %v615_v21, %v132_v26  ;;  %v122_v29 = vsel %vm119_vm4, %v120_v16, %v121_v23  ;;  %v124_v30 = vsel %vm119_vm4, %v121_v23, %v123_v19 }
  0xe0   :  { %v174_v31 = vadd.f32 %v173_v17, %v122_v29  ;;  %v177_v32 = vadd.f32 %v176_v24, %v124_v30 }
  0xe1   :  { %v620_v33 = vpop.f32.mrb[4].mxu0  ;;  %v626_v34 = vpop.f32.mrb[4].mxu1 }
  0xe2   :  { %v231_v35 = vpop.f32.mrb[5].mxu0  ;;  %v334_v36 = vrot.slane %v626_v34, 3  ;;  %v311_v38 = vpop.f32.mrb[5].mxu1  ;;  %v254_v40 = vrot.slane %v620_v33, 2 }
  0xe3   :  { %v251_v37 = vrot.slane %v231_v35, 2  ;;  %v621_v39 = vpop.f32.mrb[6].mxu0  ;;  %v331_v41 = vrot.slane %v311_v38, 3  ;;  %v627_v43 = vpop.f32.mrb[6].mxu1  ;;  %v582_v38 = vld [vmem:[%s854_s7] ss:$0 sm:$0xff] }
  0xe4   :  { %v256_v42 = vrot.slane %v621_v39, 2  ;;  %v234_v44 = vpop.f32.mrb[7].mxu0  ;;  %v336_v45 = vrot.slane %v627_v43, 3  ;;  %v314_v47 = vpop.f32.mrb[7].mxu1 }
  0xe5   :  { %v252_v46 = vrot.slane %v234_v44, 2  ;;  %v332_v50 = vrot.slane %v314_v47, 3 }
  0xe6   :  { %v257_v48 = vsel %vm250_vm5, %v254_v40, %v256_v42  ;;  %v263_v49 = vsel %vm250_vm5, %v256_v42, %v251_v37  ;;  %v337_v53 = vsel %vm330_vm6, %v334_v36, %v336_v45  ;;  %v343_v54 = vsel %vm330_vm6, %v336_v45, %v331_v41 }
  0xe7   :  { %v266_v51 = vadd.f32 %v257_v48, %v182_v27  ;;  %v267_v52 = vadd.f32 %v263_v49, %v185_v28  ;;  %v253_v56 = vsel %vm250_vm5, %v251_v37, %v252_v46  ;;  %v255_v57 = vsel %vm250_vm5, %v252_v46, %v254_v40 }
  0xe8   :  { %v333_v58 = vsel %vm330_vm6, %v331_v41, %v332_v50  ;;  %v335_v59 = vsel %vm330_vm6, %v332_v50, %v334_v36  ;;  %v264_v62 = vadd.f32 %v253_v56, %v174_v31  ;;  %v265_v63 = vadd.f32 %v255_v57, %v177_v32 }
  0xe9   :  { %v346_v60 = vadd.f32 %v337_v53, %v266_v51  ;;  %v347_v61 = vadd.f32 %v343_v54, %v267_v52  ;;  %v522_v34 = vpop.f32.mrb[8].mxu1 }
  0xea   :  { %v344_v2 = vadd.f32 %v333_v58, %v264_v62  ;;  %v345_v3 = vadd.f32 %v335_v59, %v265_v63  ;;  %v642_v35 = vpop.f32.mrb[9].mxu1  ;;  %v523_v39 = vadd.f32 %v582_v38, %v522_v34 }
  0xeb   :  { %v357_v0 = vadd.f32 %v577_v55, %v346_v60  ;;  %v358_v1 = vadd.f32 %v577_v55, %v347_v61  ;;  %v525_v36 = vpop.f32.mrb[10].mxu1 }
  0xec   :  { %v355_v6 = vadd.f32 %v577_v55, %v344_v2  ;;  %v356_v7 = vadd.f32 %v577_v55, %v345_v3  ;;  %v643_v37 = vpop.f32.mrb[11].mxu1  ;;  %528 = vst.msk [vmem:[#allocation4] sm:$0x3] %vm458_vm10, %v523_v39 }
  0xed   :  { %v361_v4 = vmax.f32 %v357_v0, 0.0  ;;  %v362_v5 = vmax.f32 %v358_v1, 0.0 }
  0xee   :  { %v359_v8 = vmax.f32 %v355_v6, 0.0  ;;  %v360_v9 = vmax.f32 %v356_v7, 0.0 }
  0xef   :  { %v374_v10 = vsel %vm363_vm7, %v361_v4, 0.0  ;;  %v375_v11 = vsel %vm365_vm8, %v362_v5, 0.0 }
  0xf0   :  { %v376_v12 = vadd.f32 %v375_v11, %v374_v10  ;;  %v364_v13 = vsel %vm363_vm7, %v359_v8, 0.0  ;;  %v366_v14 = vsel %vm365_vm8, %v360_v9, 0.0 }
  0xf1   :  { %v367_v15 = vadd.f32 %v366_v14, %v364_v13 }
  0xf2   :  { %v377_v16 = vrot.slane %v376_v12, 4 }
  0xf3   :  { %v368_v17 = vrot.slane %v367_v15, 4 }
  0xf4   :  { %v378_v18 = vadd.f32 %v377_v16, %v376_v12 }
  0xf5   :  { %v369_v19 = vadd.f32 %v368_v17, %v367_v15 }
  0xf6   :  { %v379_v20 = vrot.slane %v378_v18, 2 }
  0xf7   :  { %v370_v21 = vrot.slane %v369_v19, 2 }
  0xf8   :  { %v380_v22 = vadd.f32 %v379_v20, %v378_v18 }
  0xf9   :  { %v371_v23 = vadd.f32 %v370_v21, %v369_v19 }
  0xfa   :  { %v381_v24 = vrot.slane %v380_v22, 1 }
  0xfb   :  { %v372_v25 = vrot.slane %v371_v23, 1 }
  0xfc   :  { %v382_v26 = vadd.f32 %v381_v24, %v380_v22 }
  0xfd   :  { %v373_v27 = vadd.f32 %v372_v25, %v371_v23 }
  0xfe   :  { %v384_v28 = vpack.c.bf16 %v382_v26, %v382_v26 }
  0xff   :  { %v383_v29 = vpack.c.bf16 %v373_v27, %v373_v27 }
 0x100   :  { %v399_v30 = vunpack.c.l.b16 %v384_v28 }
 0x101   :  { %v398_v31 = vunpack.c.l.b16 %v383_v29 }
 0x103   :  { %v401_v32 = vsel %vm400_vm9, %v399_v30, %v398_v31 }
 0x104   :  { %v402_v33 = vpack.c.b16 %v401_v32, %v401_v32 }
 0x106   :  { %633 = vmatmul.mubr.msk.bf16.vlgmr.msra.gmra.mrb[8].mxu0 %vm363_vm7, %v402_v33 }
 0x107   :  { %669 = shalt.err (!%p666_p4)
}
 0x108   :  { %s670_s13 = scalar_lea.hbm %s856_s9, 32 }
 0x109   :  { %p671_p5 = scmp.ne.s32.totalorder %s856_s9, %s670_s13  ;;  %p674_p6 = scmp.lt.u32.totalorder %s670_s13, %s856_s9 }
 0x10b   :  { %p676_p7 = pnand %p674_p6, %p671_p5 }
 0x10d   :  { %679 = shalt.err (!%p676_p7)
}
 0x10e   :  { %548 = dma.vmem_to_hbm [thread:$0]  %s546_s30, 32, %s856_s9, [#allocation5]   ;;  %v578_v40 = vld [vmem:[%s852_s5] ss:$0 sm:$0xff] }
 0x10f   :  { %s709_s0 = smov [#allocation2]  }
 0x110   :  { %s535_s21 = sshll.u32 %s709_s0, 4  ;;  %s536_s21 = int_to_ptr.vmem [resolvable:$true] %s535_s21 }
 0x111   :  { %s680_s2 = scalar_lea.vmem %s536_s21, 32  ;;  %p685_p9 = scmp.lt.s32.totalorder %s536_s21, %s536_s21 }
 0x112   :  { %p681_p8 = scmp.ne.s32.totalorder %s536_s21, %s680_s2  ;;  %p686_p10 = scmp.lt.s32.totalorder %s680_s2, %s680_s2 }
 0x114   :  { %p687_p11 = por %p686_p10, %p685_p9 }
 0x116   :  { %p688_p12 = pnand %p687_p11, %p681_p8 }
 0x1d9   :  { %v452_v41 = vpop.f32.mrb[8].mxu0 }
 0x1da   :  { %v453_v42 = vadd.f32 %v578_v40, %v452_v41  ;;  %v634_v43 = vpop.f32.mrb[9].mxu0 }
 0x1db   :  { %v455_v44 = vpop.f32.mrb[10].mxu0 }
 0x1dc   :  { %v635_v45 = vpop.f32.mrb[11].mxu0  ;;  %459 = vst.msk [vmem:[#allocation2] sm:$0x3] %vm458_vm10, %v453_v42 }
 0x1dd   :  { %691 = shalt.err (!%p688_p12)
}
 0x1de   :  { %s692_s5 = scalar_lea.hbm %s855_s8, 32 }
 0x1df   :  { %p693_p13 = scmp.ne.s32.totalorder %s855_s8, %s692_s5  ;;  %p696_p0 = scmp.lt.u32.totalorder %s692_s5, %s855_s8 }
 0x1e1   :  { %p698_p1 = pnand %p696_p0, %p693_p13 }
 0x1e3   :  { %701 = shalt.err (!%p698_p1)
}
 0x1e4   :  { %538 = dma.vmem_to_hbm [thread:$0]  %s536_s21, 32, %s855_s8, [#allocation3]  }
 0x1e5   :  { %702 = dma.done.wait [#allocation3], 32  }
 0x1e6   :  { %703 = vsyncadd [#allocation3], 4294967264 }
 0x1e7   :  { %704 = dma.done.wait [#allocation5], 32  }
 0x1e8   :  { %705 = vsyncadd [#allocation5], 4294967264 }
 0x1e9   :  { %555 = vsyncpa [#allocation3], 1 }
 0x1ea   :  { %556 = vsyncpa [#allocation5], 1 }

</bundles_post_ra>
